<compile_context>
chip_gen: v7x
topology: tpu7x:2x2x1
jax: 0.10.0
libtpu: 0.0.40
codegen_flags: <defaults>
</compile_context>

<pallas_src>
import jax
import jax.numpy as jnp
from jax.experimental import pallas as pl
from jax.experimental.pallas import tpu as pltpu


def _round_up(x, m):
    return -(-x // m) * m


def _nddr_kernel(x_ref, w_ref, shift_ref, o_ref):
    # x_ref:     (TILE_N, C_in)     f32 activations (one row tile, streamed)
    # w_ref:     (C_in,  OUT_PAD)   f32 stacked conv weights, BN scale folded
    # shift_ref: (1,     OUT_PAD)   f32 folded BN shift (conv bias included)
    # o_ref:     (TILE_N, OUT_PAD)  narrow output (bf16 default), 128-lane dense
    y = jnp.dot(x_ref[...], w_ref[...], preferred_element_type=jnp.float32)
    y = y + shift_ref[...]
    o_ref[...] = jnp.maximum(y, 0.0).astype(o_ref.dtype)


def prepare_params(w_stack, shift):
    """One-time parameter prep (hoisted out of the per-call forward path).

    Pads the stacked output width to a multiple of 128 lanes so the kernel's
    output stores are unmasked and lane-dense.  Zero weight/shift columns give
    ReLU(0) = 0 in the padded region, so semantics are preserved.

    w_stack: (C_in, T*C_out) f32, BN scale already folded in.
    shift:   (1,   T*C_out)  f32 folded BN shift.
    Returns: (w_pad, shift_pad, total_out) with padded width a 128 multiple.
    """
    total_out = w_stack.shape[1]
    out_pad = _round_up(max(total_out, 128), 128)
    if out_pad != total_out:
        w_stack = jnp.pad(w_stack, ((0, 0), (0, out_pad - total_out)))
        shift = jnp.pad(shift, ((0, 0), (0, out_pad - total_out)))
    return (w_stack.astype(jnp.float32), shift.astype(jnp.float32), total_out)


def nddr_forward(x_ncl, w_pad, shift_pad, total_out=None, *,
                 tile_n=4096, out_dtype=jnp.bfloat16, trim_output=True):
    """Fused nddr_layer forward.

    x_ncl:     (N, C_in, 1)     Net_F input; L must be 1 (as the module requires).
    w_pad:     (C_in, OUT_PAD)  from prepare_params (OUT_PAD is a 128 multiple).
    shift_pad: (1,   OUT_PAD)   from prepare_params.
    total_out: true T*C_out; only needed when trim_output=True.
    Returns:   (N, total_out) if trim_output else (N, OUT_PAD) with columns
               >= total_out guaranteed zero (ReLU of zero-padded params).
    """
    assert x_ncl.shape[-1] == 1, "nddr_layer forward requires L == 1"
    n, c_in = x_ncl.shape[0], x_ncl.shape[1]
    out_pad = w_pad.shape[1]
    assert out_pad % 128 == 0 and shift_pad.shape == (1, out_pad)

    # Dropping the trailing unit dim is a metadata-only reshape (no copy).
    x = x_ncl.reshape(n, c_in).astype(jnp.float32)

    # ---- row-tile selection ------------------------------------------------
    # (a) VMEM budget: double-buffered x tile + out tile <= ~16 MiB, leaving
    #     headroom under the scoped-VMEM default on v5e/v6e/v7x.
    bytes_per_row = 2 * (c_in * 4 + out_pad * jnp.dtype(out_dtype).itemsize)
    vmem_cap_rows = max(8, (16 * 1024 * 1024 // bytes_per_row) // 8 * 8)
    tile_n = min(tile_n, vmem_cap_rows)
    # (b) Ensure >= 2 grid steps when there is enough work, so the "parallel"
    #     grid axis actually shards across both TensorCores on v7x.
    tile_n = min(tile_n, max(8, _round_up(-(-n // 2), 8)))
    tile_n = max(8, _round_up(tile_n, 8))
    # (c) Prefer an even step count (balanced megacore split on v7x).
    steps = -(-n // tile_n)
    if steps > 1 and steps % 2 == 1:
        tile_n = max(8, _round_up(-(-n // (steps + 1)), 8))

    grid = (pl.cdiv(n, tile_n),)  # no N padding; partial last block is masked

    out = pl.pallas_call(
        _nddr_kernel,
        out_shape=jax.ShapeDtypeStruct((n, out_pad), out_dtype),
        grid=grid,
        in_specs=[
            # Streamed over the batch grid axis (auto double-buffered).
            pl.BlockSpec((tile_n, c_in), lambda i: (i, 0)),
            # Parameters: constant block index -> resident in VMEM across steps.
            pl.BlockSpec((c_in, out_pad), lambda i: (0, 0)),
            pl.BlockSpec((1, out_pad), lambda i: (0, 0)),
        ],
        out_specs=pl.BlockSpec((tile_n, out_pad), lambda i: (i, 0)),
        compiler_params=pltpu.CompilerParams(
            dimension_semantics=("parallel",),
        ),
    )(x, w_pad, shift_pad)

    if trim_output and total_out is not None and total_out != out_pad:
        # Extra HBM pass over the output; pass trim_output=False (and consume
        # the zero-padded columns downstream) to avoid it.
        out = out[:, :total_out]
    return out


def make_params(key, in_channels, out_channels, task_num, eps=1e-5):
    """Deterministic per-task Conv1d + BatchNorm1d params, BN folded (eval mode).

        y_task = x @ (W_i^T * s_i) + shift_i ;  s_i = gamma / sqrt(var + eps)
        shift_i = beta + (bias - running_mean) * s_i

    Returns the unpadded (w_stack, shift); run prepare_params() once on them.
    """
    keys = jax.random.split(key, task_num * 4)
    w_list, shift_list = [], []
    for i in range(task_num):
        kw, kb, kg, kbeta = keys[4 * i: 4 * i + 4]
        # Conv1d(kernel=1) weight: (C_out, C_in), bias: (C_out,)
        w = jax.random.normal(kw, (out_channels, in_channels), jnp.float32) * 0.1
        b = jax.random.normal(kb, (out_channels,), jnp.float32) * 0.1
        # BatchNorm1d affine params + running stats (eval mode).
        gamma = 1.0 + 0.05 * jax.random.normal(kg, (out_channels,), jnp.float32)
        beta = 0.05 * jax.random.normal(kbeta, (out_channels,), jnp.float32)
        running_mean = jnp.zeros((out_channels,), jnp.float32)
        running_var = jnp.ones((out_channels,), jnp.float32)
        s = gamma / jnp.sqrt(running_var + eps)           # (C_out,)
        sh = beta + (b - running_mean) * s                # (C_out,)
        w_list.append(w.T * s[None, :])                   # (C_in, C_out), scale folded
        shift_list.append(sh)
    w_stack = jnp.concatenate(w_list, axis=1)             # (C_in, T*C_out)
    shift = jnp.concatenate(shift_list)[None, :]          # (1, T*C_out)
    return w_stack, shift


def reference_forward(x_ncl, w_stack, shift):
    x = x_ncl[:, :, 0].astype(jnp.float32)
    y = x @ w_stack + shift
    return jnp.maximum(y, 0.0)


if __name__ == "__main__":
    # Small shapes consistent with the module's forward (L must be 1).
    N, C_IN, C_OUT, TASK_NUM = 8, 16, 32, 3

    key = jax.random.PRNGKey(0)
    k_x, k_p = jax.random.split(key)
    x = jax.random.normal(k_x, (N, C_IN, 1), jnp.float32)   # Net_F: (N, C_in, 1)

    w_stack, shift = make_params(k_p, C_IN, C_OUT, TASK_NUM)
    # One-time parameter prep (pad to 128 lanes); NOT repeated per forward call.
    w_pad, shift_pad, total_out = prepare_params(w_stack, shift)

    out = nddr_forward(x, w_pad, shift_pad, total_out)
    out = jax.block_until_ready(out)

    ref = reference_forward(x, w_stack, shift)
    assert out.shape == (N, TASK_NUM * C_OUT), out.shape
    # f32 matmul/accumulate; only the final store is bf16 -> tight tolerance.
    err = float(jnp.max(jnp.abs(out.astype(jnp.float32) - ref)))
    assert jnp.allclose(out.astype(jnp.float32), ref, atol=2e-2, rtol=2e-2), err

    # TODO(synk): BatchNorm is folded in eval mode (running stats); PyTorch's
    # default training-mode batch statistics are not reproduced here.
    print("KERNEL_OK")
</pallas_src>

<mosaic_0001>
module attributes {stable_mosaic.version = 11 : i64} {
  func.func @_nddr_kernel(%arg0: i32, %arg1: memref<8x16xf32, #tpu.memory_space<vmem>>, %arg2: memref<16x128xf32, #tpu.memory_space<vmem>>, %arg3: memref<1x128xf32, #tpu.memory_space<vmem>>, %arg4: memref<8x128xbf16, #tpu.memory_space<vmem>>) attributes {dimension_semantics = [#tpu.dimension_semantics<parallel>], iteration_bounds = array<i64: 1>, scalar_prefetch = 0 : i64, scratch_operands = 0 : i64, tpu.core_type = #tpu.core_type<tc>, window_params = [{transform_indices = @transform_0, window_bounds = array<i64: 8, 16>}, {pipeline_mode = #tpu.pipeline_mode<synchronous>, transform_indices = @transform_1, window_bounds = array<i64: 16, 128>}, {pipeline_mode = #tpu.pipeline_mode<synchronous>, transform_indices = @transform_2, window_bounds = array<i64: 1, 128>}, {transform_indices = @transform_3, window_bounds = array<i64: 8, 128>}]} {
    %c0 = arith.constant 0 : index
    %c0_0 = arith.constant 0 : index
    %0 = vector.load %arg1[%c0, %c0_0] : memref<8x16xf32, #tpu.memory_space<vmem>>, vector<8x16xf32>
    %c0_1 = arith.constant 0 : index
    %c0_2 = arith.constant 0 : index
    %1 = vector.load %arg2[%c0_1, %c0_2] : memref<16x128xf32, #tpu.memory_space<vmem>>, vector<16x128xf32>
    %cst = arith.constant dense<0.000000e+00> : vector<8x128xf32>
    %2 = tpu.matmul %0, %1, %cst {dimension_numbers = #tpu.dot_dimension_numbers<[1], [0], [0], [1], [0, 0, 1, 1], [], []>} : vector<8x16xf32>, vector<16x128xf32>, vector<8x128xf32> -> vector<8x128xf32>
    %c0_3 = arith.constant 0 : index
    %c0_4 = arith.constant 0 : index
    %3 = vector.load %arg3[%c0_3, %c0_4] : memref<1x128xf32, #tpu.memory_space<vmem>>, vector<1x128xf32>
    %4 = vector.broadcast %3 : vector<1x128xf32> to vector<8x128xf32>
    %5 = arith.addf %2, %4 : vector<8x128xf32>
    %cst_5 = arith.constant 0.000000e+00 : f32
    %6 = vector.broadcast %cst_5 : f32 to vector<8x128xf32>
    %7 = arith.maximumf %5, %6 : vector<8x128xf32>
    %8 = arith.truncf %7 : vector<8x128xf32> to vector<8x128xbf16>
    %c0_6 = arith.constant 0 : index
    %c0_7 = arith.constant 0 : index
    %9 = vector.load %arg4[%c0_6, %c0_7] : memref<8x128xbf16, #tpu.memory_space<vmem>>, vector<8x128xbf16>
    tpu.vector_store %arg4[%c0_6, %c0_7], %8 {strides = array<i32>} : memref<8x128xbf16, #tpu.memory_space<vmem>>, vector<8x128xbf16>,
    return
  }
  func.func @transform_0(%arg0: i32) -> (i32, i32) {
    %c0_i32 = arith.constant 0 : i32
    %c0_i32_0 = arith.constant 0 : i32
    return %arg0, %c0_i32 : i32, i32
  }
  func.func @transform_1(%arg0: i32) -> (i32, i32) {
    %c0_i32 = arith.constant 0 : i32
    %c0_i32_0 = arith.constant 0 : i32
    %c0_i32_1 = arith.constant 0 : i32
    return %c0_i32, %c0_i32_0 : i32, i32
  }
  func.func @transform_2(%arg0: i32) -> (i32, i32) {
    %c0_i32 = arith.constant 0 : i32
    %c0_i32_0 = arith.constant 0 : i32
    %c0_i32_1 = arith.constant 0 : i32
    return %c0_i32, %c0_i32_0 : i32, i32
  }
  func.func @transform_3(%arg0: i32) -> (i32, i32) {
    %c0_i32 = arith.constant 0 : i32
    %c0_i32_0 = arith.constant 0 : i32
    return %arg0, %c0_i32 : i32, i32
  }
}

</mosaic_0001>

<bundles_post_ra>
// kernel: tpu_custom_call.1
= control target key start
LH: loop header
LB: loop body
LE: loop exit
PB: predicated region body
PF: predicated region fallthrough
CT: control target
= control target key end

     0   :  { %8 = vsyncpa [#allocation3], 0  ;;  %s313_s0 = inlined_call_operand.hbm [shape: f32[8,16], index: 0, kind: input, shape index: {}]   ;;  %s314_s1 = inlined_call_operand.hbm [shape: f32[16,128], index: 1, kind: input, shape index: {}]   ;;  %s315_s2 = inlined_call_operand.vmem [shape: f32[1,128], index: 2, kind: input, shape index: {}]   ;;  %s316_s3 = inlined_call_operand.hbm [shape: bf16[8,128], index: 3, kind: output, shape index: {}]  }
   0x1   :  { %9 = vsyncpa [#allocation6], 0 }
   0x2   :  { %10 = vsyncpa [#allocation4], 0  ;;  %s239_s12 = smov [#allocation2]   ;;  %s240_s14 = smov [#allocation5]  }
   0x3   :  { %s17_s13 = sshll.u32 %s239_s12, 4  ;;  %s26_s15 = sshll.u32 %s240_s14, 4  ;;  %s18_s13 = int_to_ptr.vmem [resolvable:$true] %s17_s13  ;;  %s267_s15 = int_to_ptr.vmem [resolvable:$true] %s26_s15 }
   0x4   :  { %s167_s18 = scalar_lea.hbm %s313_s0, 128 }
   0x5   :  { %p168_p0 = scmp.ne.s32.totalorder %s313_s0, %s167_s18  ;;  %p171_p1 = scmp.lt.u32.totalorder %s167_s18, %s313_s0 }
   0x7   :  { %p173_p2 = pnand %p171_p1, %p168_p0 }
   0x9   :  { %176 = shalt.err (!%p173_p2)
}
   0xa   :  { %s177_s23 = scalar_lea.vmem %s18_s13, 128  ;;  %p182_p4 = scmp.lt.s32.totalorder %s18_s13, %s18_s13 }
   0xb   :  { %p178_p3 = scmp.ne.s32.totalorder %s18_s13, %s177_s23  ;;  %p183_p5 = scmp.lt.s32.totalorder %s177_s23, %s177_s23 }
   0xd   :  { %p184_p6 = por %p183_p5, %p182_p4 }
   0xf   :  { %p185_p7 = pnand %p184_p6, %p178_p3 }
  0x11   :  { %188 = shalt.err (!%p185_p7)
}
  0x12   :  { %20 = dma.hbm_to_vmem [thread:$0]  %s313_s0, 128, %s18_s13, [#allocation3]  }
  0x13   :  { %s189_s28 = scalar_lea.hbm %s314_s1, 256 }
  0x14   :  { %p190_p8 = scmp.ne.s32.totalorder %s314_s1, %s189_s28  ;;  %p193_p9 = scmp.lt.u32.totalorder %s189_s28, %s314_s1 }
  0x16   :  { %p195_p10 = pnand %p193_p9, %p190_p8 }
  0x18   :  { %198 = shalt.err (!%p195_p10)
}
  0x19   :  { %s199_s6 = scalar_lea.vmem %s267_s15, 256  ;;  %p204_p12 = scmp.lt.s32.totalorder %s267_s15, %s267_s15 }
  0x1a   :  { %p200_p11 = scmp.ne.s32.totalorder %s267_s15, %s199_s6  ;;  %p205_p13 = scmp.lt.s32.totalorder %s199_s6, %s199_s6 }
  0x1c   :  { %p206_p0 = por %p205_p13, %p204_p12 }
  0x1e   :  { %p207_p1 = pnand %p206_p0, %p200_p11 }
  0x20   :  { %210 = shalt.err (!%p207_p1)
}
  0x21   :  { %s241_s0 = smov 128   ;;  %s242_s7 = smov 8  }
  0x22   :  { %32 = dma.hbm_to_vmem [thread:$0]  %s314_s1, 256, %s267_s15, [#allocation6], %s241_s0, %s241_s0, %s242_s7  }
  0x23   :  { %233 = dma.done.wait [#allocation3], 128  }
  0x24   :  { %234 = vsyncadd [#allocation3], 4294967168 }
  0x25   :  { %235 = dma.done.wait [#allocation6], 256  }
  0x26   :  { %236 = vsyncadd [#allocation6], 4294967040  ;;  %v243_v0 = vmov 0.0|0.0   ;;  %vm244_vm0 = vmmov 0   ;;  %v245_v1 = vmov 0.0   ;;  %v42_v2 = vld [vmem:[#allocation5] sm:$0xff] }
  0x27   :  { %156 = vmatprep.subr.bf16.mxu0 %v243_v0  ;;  %153 = vmatprep.mubr.msk.f32.mxu0 %vm244_vm0, %v245_v1  ;;  %v43_v3 = vld [vmem:[#allocation5 + $0x8] sm:$0xff]  ;;  %v41_v5 = vld [vmem:[#allocation2] sm:$0xff]  ;;  %vm51_vm1 = vcmask 130048   ;;  %s246_s1 = smov [#allocation7]  }
  0x28   :  { %v157_v4 = vpack.c.bf16 %v43_v3, %v42_v2  ;;  %v144_v6 = vld [vmem:[%s315_s2] ss:$0 sm:$0xff]  ;;  %s134_s12 = sshll.u32 %s246_s1, 4  ;;  %s135_s12 = int_to_ptr.vmem [resolvable:$true] %s134_s12 }
  0x29   :  { %s211_s13 = scalar_lea.vmem %s135_s12, 64  ;;  %p216_p3 = scmp.lt.s32.totalorder %s135_s12, %s135_s12 }
  0x2a   :  { %158 = vmatpush3.bf16.msra.mxu0 %v157_v4  ;;  %p212_p2 = scmp.ne.s32.totalorder %s135_s12, %s211_s13  ;;  %p217_p4 = scmp.lt.s32.totalorder %s211_s13, %s211_s13 }
  0x2c   :  { %p218_p5 = por %p217_p4, %p216_p3 }
  0x2d   :  { %154 = vmatmul.mubr.msk.f32.vlgmr.msra.gmra.mrb[0].mxu0 %vm51_vm1, %v41_v5 }
  0x2e   :  { %p219_p6 = pnand %p218_p5, %p212_p2 }
 0x100   :  { %v121_v7 = vpop.f32.mrb[0].mxu0 }
 0x101   :  { %v122_v8 = vadd.f32 %v144_v6, %v121_v7  ;;  %v155_v9 = vpop.f32.mrb[1].mxu0 }
 0x103   :  { %v125_v10 = vmax.f32 %v122_v8, 0.0 }
 0x105   :  { %v126_v11 = vpack.c.bf16 %v125_v10, %v125_v10 }
 0x107   :  { %127 = vst [vmem:[#allocation7] sm:$0xf] %v126_v11 }
 0x108   :  { %222 = shalt.err (!%p219_p6)
}
 0x109   :  { %s223_s2 = scalar_lea.hbm %s316_s3, 64 }
 0x10a   :  { %p224_p7 = scmp.ne.s32.totalorder %s316_s3, %s223_s2  ;;  %p227_p8 = scmp.lt.u32.totalorder %s223_s2, %s316_s3 }
 0x10c   :  { %p229_p9 = pnand %p227_p8, %p224_p7 }
 0x10e   :  { %232 = shalt.err (!%p229_p9)
}
 0x10f   :  { %137 = dma.vmem_to_hbm [thread:$0]  %s135_s12, 64, %s316_s3, [#allocation4]  }
 0x110   :  { %237 = dma.done.wait [#allocation4], 64  }
 0x111   :  { %238 = vsyncadd [#allocation4], 4294967232 }
 0x112   :  { %141 = vsyncpa [#allocation3], 1 }
 0x113   :  { %142 = vsyncpa [#allocation6], 1 }
 0x114   :  { %143 = vsyncpa [#allocation4], 1 }

</bundles_post_ra>
